<compile_context>
chip_gen: v5e
topology: v5e:2x2
jax: 0.10.0
libtpu: 0.0.40
codegen_flags: <defaults>
</compile_context>

<pallas_src>
import functools

import jax
import jax.numpy as jnp
from jax import lax
from jax.experimental import pallas as pl
from jax.experimental.pallas import tpu as pltpu


def _round_up(x, m):
    return ((x + m - 1) // m) * m


def _make_gather_kernel(TN, NT):
    """Per (batch, roi_tile): gather 4 corner rows per ROI and blend on the VPU."""

    def kernel(idx_ref, w_ref, feat_ref, out_ref, gath_ref):
        # idx_ref : SMEM (scalar prefetch), (B*N_pad*4,) int32 flat corner indices
        # w_ref   : VMEM (1, TN, 4) f32 bilinear weights for this ROI tile
        # feat_ref: VMEM (1, HW, C) f32 channels-last BEV map for this batch
        # out_ref : VMEM (1, TN, C)
        # gath_ref: VMEM scratch (4, TN, C) gathered corner rows
        b = pl.program_id(0)
        t = pl.program_id(1)
        base = (b * NT + t) * (TN * 4)

        def body(n, carry):
            off = base + n * 4
            for k in range(4):  # static unroll over the 4 bilinear corners
                row = idx_ref[off + k]  # scalar int32 from SMEM
                gath_ref[k, pl.ds(n, 1), :] = feat_ref[0, pl.ds(row, 1), :]
            return carry

        lax.fori_loop(0, TN, body, 0, unroll=min(8, TN))

        w = w_ref[0]  # (TN, 4)
        out = (gath_ref[0] * w[:, 0:1]
               + gath_ref[1] * w[:, 1:2]
               + gath_ref[2] * w[:, 2:3]
               + gath_ref[3] * w[:, 3:4])
        out_ref[0] = out.astype(out_ref.dtype)

    return kernel


class BEVFeatureExtractorV2:
    """JAX/Pallas port of pcdet BEVFeatureExtractorV2 (num_point == 1 path)."""

    def __init__(self, model_cfg, pc_start, voxel_size, out_stride, num_point):
        self.pc_start = tuple(float(v) for v in pc_start)
        self.voxel_size = tuple(float(v) for v in voxel_size)
        self.out_stride = float(out_stride)
        self.num_point = int(num_point)
        if self.num_point != 1:
            # TODO(synk): num_point == 5 path needs center_to_corner_box2d_pillar
            # (not provided in the reference module); only num_point == 1 is implemented.
            raise NotImplementedError("only num_point == 1 is implemented")

    @functools.partial(jax.jit, static_argnums=0)
    def __call__(self, spatial_features_2d, rois):
        # spatial_features_2d: (B, C, H, W) float32 (NCHW, as in PyTorch)
        # rois:                (B, N, 7+)   float32
        B, C, H, W = spatial_features_2d.shape
        N = rois.shape[1]
        HW = H * W
        f32 = jnp.float32

        # TODO(synk): fold this NCHW->NHWC conversion upstream / into the DMA.
        bev = jnp.transpose(spatial_features_2d, (0, 2, 3, 1)).reshape(B, HW, C)

        # absl_to_relative + bilinear corner/weight precompute (O(B*N), cheap,
        # int32 index math — no float round-trip).
        cx = rois[:, :, 0]
        cy = rois[:, :, 1]
        x = (cx - self.pc_start[0]) / self.voxel_size[0] / self.out_stride
        y = (cy - self.pc_start[1]) / self.voxel_size[1] / self.out_stride
        x0 = jnp.floor(x).astype(jnp.int32)
        x1 = x0 + 1
        y0 = jnp.floor(y).astype(jnp.int32)
        y1 = y0 + 1
        x0 = jnp.clip(x0, 0, W - 1)
        x1 = jnp.clip(x1, 0, W - 1)
        y0 = jnp.clip(y0, 0, H - 1)
        y1 = jnp.clip(y1, 0, H - 1)
        # Weights from the CLAMPED integer coords (torch semantics).
        wa = (x1.astype(f32) - x) * (y1.astype(f32) - y)
        wb = (x1.astype(f32) - x) * (y - y0.astype(f32))
        wc = (x - x0.astype(f32)) * (y1.astype(f32) - y)
        wd = (x - x0.astype(f32)) * (y - y0.astype(f32))
        ia = y0 * W + x0
        ib = y1 * W + x0
        ic = y0 * W + x1
        idd = y1 * W + x1

        idx = jnp.stack([ia, ib, ic, idd], axis=-1).astype(jnp.int32)  # (B, N, 4)
        wts = jnp.stack([wa, wb, wc, wd], axis=-1).astype(f32)         # (B, N, 4)

        # ROI tiling: parallel grid axis (feeds both TCs on v7x, deepens pipeline).
        TN = min(128, _round_up(N, 8))
        N_pad = _round_up(N, TN)
        NT = N_pad // TN
        pad = N_pad - N
        if pad:
            idx = jnp.pad(idx, ((0, 0), (0, pad), (0, 0)))   # index 0, weight 0 -> zero rows
            wts = jnp.pad(wts, ((0, 0), (0, pad), (0, 0)))

        idx_flat = idx.reshape(-1)  # (B*N_pad*4,) int32 -> SMEM scalar prefetch

        kernel = _make_gather_kernel(TN, NT)

        # Explicit VMEM budget sized from lane/sublane-padded tiles + headroom.
        C_pad = _round_up(C, 128)
        HW_pad = _round_up(HW, 8)
        feat_buf = HW_pad * C_pad * 4
        w_buf = TN * 128 * 4
        out_buf = TN * C_pad * 4
        scratch_buf = 4 * TN * C_pad * 4
        vmem_limit = min(100 * 1024 * 1024,
                         2 * feat_buf + 2 * w_buf + 2 * out_buf + scratch_buf + (4 << 20))

        out = pl.pallas_call(
            kernel,
            out_shape=jax.ShapeDtypeStruct((B, N_pad, C), jnp.float32),
            grid_spec=pltpu.PrefetchScalarGridSpec(
                num_scalar_prefetch=1,
                grid=(B, NT),
                in_specs=[
                    pl.BlockSpec((1, TN, 4), lambda b, t, idx_ref: (b, t, 0)),
                    pl.BlockSpec((1, HW, C), lambda b, t, idx_ref: (b, 0, 0)),
                ],
                out_specs=pl.BlockSpec((1, TN, C), lambda b, t, idx_ref: (b, t, 0)),
                scratch_shapes=[pltpu.VMEM((4, TN, C), jnp.float32)],
            ),
            compiler_params=pltpu.CompilerParams(
                dimension_semantics=("parallel", "parallel"),
                vmem_limit_bytes=int(vmem_limit)),
        )(idx_flat, wts, bev)

        return out[:, :N, :]  # (B, N, C)


def _reference_forward(spatial_features_2d, rois, pc_start, voxel_size, out_stride):
    """Pure-JAX reference mirroring the torch code (for correctness check)."""
    B, C, H, W = spatial_features_2d.shape
    bev = jnp.transpose(spatial_features_2d, (0, 2, 3, 1))  # (B, H, W, C)
    outs = []
    for b in range(B):
        cx = rois[b, :, 0]
        cy = rois[b, :, 1]
        x = (cx - pc_start[0]) / voxel_size[0] / out_stride
        y = (cy - pc_start[1]) / voxel_size[1] / out_stride
        x0 = jnp.floor(x).astype(jnp.int32)
        x1 = x0 + 1
        y0 = jnp.floor(y).astype(jnp.int32)
        y1 = y0 + 1
        x0 = jnp.clip(x0, 0, W - 1)
        x1 = jnp.clip(x1, 0, W - 1)
        y0 = jnp.clip(y0, 0, H - 1)
        y1 = jnp.clip(y1, 0, H - 1)
        im = bev[b]
        Ia = im[y0, x0]
        Ib = im[y1, x0]
        Ic = im[y0, x1]
        Id = im[y1, x1]
        wa = (x1.astype(x.dtype) - x) * (y1.astype(y.dtype) - y)
        wb = (x1.astype(x.dtype) - x) * (y - y0.astype(y.dtype))
        wc = (x - x0.astype(x.dtype)) * (y1.astype(y.dtype) - y)
        wd = (x - x0.astype(x.dtype)) * (y - y0.astype(y.dtype))
        outs.append(Ia * wa[:, None] + Ib * wb[:, None]
                    + Ic * wc[:, None] + Id * wd[:, None])
    return jnp.stack(outs, axis=0)


if __name__ == "__main__":
    key = jax.random.PRNGKey(0)
    B, C, H, W = 2, 32, 16, 16
    N = 8  # rois per batch

    pc_start = (0.0, -8.0)
    voxel_size = (0.5, 0.5)
    out_stride = 2
    num_point = 1

    k_feat, k_xy, k_rest = jax.random.split(key, 3)
    spatial_features_2d = jax.random.normal(k_feat, (B, C, H, W), dtype=jnp.float32)

    # ROI centers roughly inside the BEV extent (x in [0,16), y in [-8,8))
    xy = jax.random.uniform(k_xy, (B, N, 2), dtype=jnp.float32,
                            minval=jnp.array([0.5, -7.5], jnp.float32),
                            maxval=jnp.array([15.5, 7.5], jnp.float32))
    rest = jax.random.uniform(k_rest, (B, N, 5), dtype=jnp.float32)
    rois = jnp.concatenate([xy, rest], axis=-1)  # (B, N, 7)

    extractor = BEVFeatureExtractorV2(None, pc_start, voxel_size, out_stride, num_point)
    roi_features = jax.block_until_ready(extractor(spatial_features_2d, rois))

    ref = _reference_forward(spatial_features_2d, rois, pc_start, voxel_size, out_stride)
    assert roi_features.shape == (B, N, C)
    assert jnp.allclose(roi_features, ref, atol=1e-4, rtol=1e-4), "mismatch vs reference"

    print("KERNEL_OK")
</pallas_src>

<mosaic_0001>
module attributes {stable_mosaic.version = 11 : i64} {
  func.func @kernel(%arg0: i32, %arg1: i32, %arg2: memref<64xi32, #tpu.memory_space<smem>>, %arg3: memref<1x8x4xf32, #tpu.memory_space<vmem>>, %arg4: memref<1x256x32xf32, #tpu.memory_space<vmem>>, %arg5: memref<1x8x32xf32, #tpu.memory_space<vmem>>, %arg6: memref<4x8x32xf32, #tpu.memory_space<vmem>>) attributes {dimension_semantics = [#tpu.dimension_semantics<parallel>, #tpu.dimension_semantics<parallel>], iteration_bounds = array<i64: 2, 1>, scalar_prefetch = 1 : i64, scratch_operands = 1 : i64, tpu.core_type = #tpu.core_type<tc>, window_params = [{transform_indices = @transform_0, window_bounds = array<i64: 1, 8, 4>}, {transform_indices = @transform_1, window_bounds = array<i64: 1, 256, 32>}, {transform_indices = @transform_2, window_bounds = array<i64: 1, 8, 32>}]} {
    %c1_i32 = arith.constant 1 : i32
    %0 = arith.muli %arg0, %c1_i32 : i32
    %1 = arith.addi %0, %arg1 : i32
    %c32_i32 = arith.constant 32 : i32
    %2 = arith.muli %1, %c32_i32 : i32
    %c0_i32 = arith.constant 0 : i32
    %c4_i32 = arith.constant 4 : i32
    %3 = arith.muli %c0_i32, %c4_i32 : i32
    %4 = arith.addi %2, %3 : i32
    %c0_i32_0 = arith.constant 0 : i32
    %5 = arith.addi %4, %c0_i32_0 : i32
    %6 = arith.index_cast %5 : i32 to index
    %7 = memref.load %arg2[%6] : memref<64xi32, #tpu.memory_space<smem>>
    %c0 = arith.constant 0 : index
    %8 = arith.index_cast %7 : i32 to index
    %c0_1 = arith.constant 0 : index
    %9 = vector.load %arg4[%c0, %8, %c0_1] : memref<1x256x32xf32, #tpu.memory_space<vmem>>, vector<1x1x32xf32>
    %10 = vector.shape_cast %9 : vector<1x1x32xf32> to vector<1x32xf32>
    %c0_2 = arith.constant 0 : index
    %11 = arith.index_cast %c0_i32 : i32 to index
    %c0_3 = arith.constant 0 : index
    %12 = vector.load %arg6[%c0_2, %11, %c0_3] : memref<4x8x32xf32, #tpu.memory_space<vmem>>, vector<1x1x32xf32>
    %13 = vector.shape_cast %12 : vector<1x1x32xf32> to vector<1x32xf32>
    %14 = vector.shape_cast %10 : vector<1x32xf32> to vector<1x1x32xf32>
    tpu.vector_store %arg6[%c0_2, %11, %c0_3], %14 {strides = array<i32>} : memref<4x8x32xf32, #tpu.memory_space<vmem>>, vector<1x1x32xf32>,
    %c1_i32_4 = arith.constant 1 : i32
    %15 = arith.addi %4, %c1_i32_4 : i32
    %16 = arith.index_cast %15 : i32 to index
    %17 = memref.load %arg2[%16] : memref<64xi32, #tpu.memory_space<smem>>
    %c0_5 = arith.constant 0 : index
    %18 = arith.index_cast %17 : i32 to index
    %c0_6 = arith.constant 0 : index
    %19 = vector.load %arg4[%c0_5, %18, %c0_6] : memref<1x256x32xf32, #tpu.memory_space<vmem>>, vector<1x1x32xf32>
    %20 = vector.shape_cast %19 : vector<1x1x32xf32> to vector<1x32xf32>
    %c1 = arith.constant 1 : index
    %21 = arith.index_cast %c0_i32 : i32 to index
    %c0_7 = arith.constant 0 : index
    %22 = vector.load %arg6[%c1, %21, %c0_7] : memref<4x8x32xf32, #tpu.memory_space<vmem>>, vector<1x1x32xf32>
    %23 = vector.shape_cast %22 : vector<1x1x32xf32> to vector<1x32xf32>
    %24 = vector.shape_cast %20 : vector<1x32xf32> to vector<1x1x32xf32>
    tpu.vector_store %arg6[%c1, %21, %c0_7], %24 {strides = array<i32>} : memref<4x8x32xf32, #tpu.memory_space<vmem>>, vector<1x1x32xf32>,
    %c2_i32 = arith.constant 2 : i32
    %25 = arith.addi %4, %c2_i32 : i32
    %26 = arith.index_cast %25 : i32 to index
    %27 = memref.load %arg2[%26] : memref<64xi32, #tpu.memory_space<smem>>
    %c0_8 = arith.constant 0 : index
    %28 = arith.index_cast %27 : i32 to index
    %c0_9 = arith.constant 0 : index
    %29 = vector.load %arg4[%c0_8, %28, %c0_9] : memref<1x256x32xf32, #tpu.memory_space<vmem>>, vector<1x1x32xf32>
    %30 = vector.shape_cast %29 : vector<1x1x32xf32> to vector<1x32xf32>
    %c2 = arith.constant 2 : index
    %31 = arith.index_cast %c0_i32 : i32 to index
    %c0_10 = arith.constant 0 : index
    %32 = vector.load %arg6[%c2, %31, %c0_10] : memref<4x8x32xf32, #tpu.memory_space<vmem>>, vector<1x1x32xf32>
    %33 = vector.shape_cast %32 : vector<1x1x32xf32> to vector<1x32xf32>
    %34 = vector.shape_cast %30 : vector<1x32xf32> to vector<1x1x32xf32>
    tpu.vector_store %arg6[%c2, %31, %c0_10], %34 {strides = array<i32>} : memref<4x8x32xf32, #tpu.memory_space<vmem>>, vector<1x1x32xf32>,
    %c3_i32 = arith.constant 3 : i32
    %35 = arith.addi %4, %c3_i32 : i32
    %36 = arith.index_cast %35 : i32 to index
    %37 = memref.load %arg2[%36] : memref<64xi32, #tpu.memory_space<smem>>
    %c0_11 = arith.constant 0 : index
    %38 = arith.index_cast %37 : i32 to index
    %c0_12 = arith.constant 0 : index
    %39 = vector.load %arg4[%c0_11, %38, %c0_12] : memref<1x256x32xf32, #tpu.memory_space<vmem>>, vector<1x1x32xf32>
    %40 = vector.shape_cast %39 : vector<1x1x32xf32> to vector<1x32xf32>
    %c3 = arith.constant 3 : index
    %41 = arith.index_cast %c0_i32 : i32 to index
    %c0_13 = arith.constant 0 : index
    %42 = vector.load %arg6[%c3, %41, %c0_13] : memref<4x8x32xf32, #tpu.memory_space<vmem>>, vector<1x1x32xf32>
    %43 = vector.shape_cast %42 : vector<1x1x32xf32> to vector<1x32xf32>
    %44 = vector.shape_cast %40 : vector<1x32xf32> to vector<1x1x32xf32>
    tpu.vector_store %arg6[%c3, %41, %c0_13], %44 {strides = array<i32>} : memref<4x8x32xf32, #tpu.memory_space<vmem>>, vector<1x1x32xf32>,
    %c1_i32_14 = arith.constant 1 : i32
    %c4_i32_15 = arith.constant 4 : i32
    %45 = arith.muli %c1_i32_14, %c4_i32_15 : i32
    %46 = arith.addi %2, %45 : i32
    %c0_i32_16 = arith.constant 0 : i32
    %47 = arith.addi %46, %c0_i32_16 : i32
    %48 = arith.index_cast %47 : i32 to index
    %49 = memref.load %arg2[%48] : memref<64xi32, #tpu.memory_space<smem>>
    %c0_17 = arith.constant 0 : index
    %50 = arith.index_cast %49 : i32 to index
    %c0_18 = arith.constant 0 : index
    %51 = vector.load %arg4[%c0_17, %50, %c0_18] : memref<1x256x32xf32, #tpu.memory_space<vmem>>, vector<1x1x32xf32>
    %52 = vector.shape_cast %51 : vector<1x1x32xf32> to vector<1x32xf32>
    %c0_19 = arith.constant 0 : index
    %53 = arith.index_cast %c1_i32_14 : i32 to index
    %c0_20 = arith.constant 0 : index
    %54 = vector.load %arg6[%c0_19, %53, %c0_20] : memref<4x8x32xf32, #tpu.memory_space<vmem>>, vector<1x1x32xf32>
    %55 = vector.shape_cast %54 : vector<1x1x32xf32> to vector<1x32xf32>
    %56 = vector.shape_cast %52 : vector<1x32xf32> to vector<1x1x32xf32>
    tpu.vector_store %arg6[%c0_19, %53, %c0_20], %56 {strides = array<i32>} : memref<4x8x32xf32, #tpu.memory_space<vmem>>, vector<1x1x32xf32>,
    %c1_i32_21 = arith.constant 1 : i32
    %57 = arith.addi %46, %c1_i32_21 : i32
    %58 = arith.index_cast %57 : i32 to index
    %59 = memref.load %arg2[%58] : memref<64xi32, #tpu.memory_space<smem>>
    %c0_22 = arith.constant 0 : index
    %60 = arith.index_cast %59 : i32 to index
    %c0_23 = arith.constant 0 : index
    %61 = vector.load %arg4[%c0_22, %60, %c0_23] : memref<1x256x32xf32, #tpu.memory_space<vmem>>, vector<1x1x32xf32>
    %62 = vector.shape_cast %61 : vector<1x1x32xf32> to vector<1x32xf32>
    %c1_24 = arith.constant 1 : index
    %63 = arith.index_cast %c1_i32_14 : i32 to index
    %c0_25 = arith.constant 0 : index
    %64 = vector.load %arg6[%c1_24, %63, %c0_25] : memref<4x8x32xf32, #tpu.memory_space<vmem>>, vector<1x1x32xf32>
    %65 = vector.shape_cast %64 : vector<1x1x32xf32> to vector<1x32xf32>
    %66 = vector.shape_cast %62 : vector<1x32xf32> to vector<1x1x32xf32>
    tpu.vector_store %arg6[%c1_24, %63, %c0_25], %66 {strides = array<i32>} : memref<4x8x32xf32, #tpu.memory_space<vmem>>, vector<1x1x32xf32>,
    %c2_i32_26 = arith.constant 2 : i32
    %67 = arith.addi %46, %c2_i32_26 : i32
    %68 = arith.index_cast %67 : i32 to index
    %69 = memref.load %arg2[%68] : memref<64xi32, #tpu.memory_space<smem>>
    %c0_27 = arith.constant 0 : index
    %70 = arith.index_cast %69 : i32 to index
    %c0_28 = arith.constant 0 : index
    %71 = vector.load %arg4[%c0_27, %70, %c0_28] : memref<1x256x32xf32, #tpu.memory_space<vmem>>, vector<1x1x32xf32>
    %72 = vector.shape_cast %71 : vector<1x1x32xf32> to vector<1x32xf32>
    %c2_29 = arith.constant 2 : index
    %73 = arith.index_cast %c1_i32_14 : i32 to index
    %c0_30 = arith.constant 0 : index
    %74 = vector.load %arg6[%c2_29, %73, %c0_30] : memref<4x8x32xf32, #tpu.memory_space<vmem>>, vector<1x1x32xf32>
    %75 = vector.shape_cast %74 : vector<1x1x32xf32> to vector<1x32xf32>
    %76 = vector.shape_cast %72 : vector<1x32xf32> to vector<1x1x32xf32>
    tpu.vector_store %arg6[%c2_29, %73, %c0_30], %76 {strides = array<i32>} : memref<4x8x32xf32, #tpu.memory_space<vmem>>, vector<1x1x32xf32>,
    %c3_i32_31 = arith.constant 3 : i32
    %77 = arith.addi %46, %c3_i32_31 : i32
    %78 = arith.index_cast %77 : i32 to index
    %79 = memref.load %arg2[%78] : memref<64xi32, #tpu.memory_space<smem>>
    %c0_32 = arith.constant 0 : index
    %80 = arith.index_cast %79 : i32 to index
    %c0_33 = arith.constant 0 : index
    %81 = vector.load %arg4[%c0_32, %80, %c0_33] : memref<1x256x32xf32, #tpu.memory_space<vmem>>, vector<1x1x32xf32>
    %82 = vector.shape_cast %81 : vector<1x1x32xf32> to vector<1x32xf32>
    %c3_34 = arith.constant 3 : index
    %83 = arith.index_cast %c1_i32_14 : i32 to index
    %c0_35 = arith.constant 0 : index
    %84 = vector.load %arg6[%c3_34, %83, %c0_35] : memref<4x8x32xf32, #tpu.memory_space<vmem>>, vector<1x1x32xf32>
    %85 = vector.shape_cast %84 : vector<1x1x32xf32> to vector<1x32xf32>
    %86 = vector.shape_cast %82 : vector<1x32xf32> to vector<1x1x32xf32>
    tpu.vector_store %arg6[%c3_34, %83, %c0_35], %86 {strides = array<i32>} : memref<4x8x32xf32, #tpu.memory_space<vmem>>, vector<1x1x32xf32>,
    %c2_i32_36 = arith.constant 2 : i32
    %c4_i32_37 = arith.constant 4 : i32
    %87 = arith.muli %c2_i32_36, %c4_i32_37 : i32
    %88 = arith.addi %2, %87 : i32
    %c0_i32_38 = arith.constant 0 : i32
    %89 = arith.addi %88, %c0_i32_38 : i32
    %90 = arith.index_cast %89 : i32 to index
    %91 = memref.load %arg2[%90] : memref<64xi32, #tpu.memory_space<smem>>
    %c0_39 = arith.constant 0 : index
    %92 = arith.index_cast %91 : i32 to index
    %c0_40 = arith.constant 0 : index
    %93 = vector.load %arg4[%c0_39, %92, %c0_40] : memref<1x256x32xf32, #tpu.memory_space<vmem>>, vector<1x1x32xf32>
    %94 = vector.shape_cast %93 : vector<1x1x32xf32> to vector<1x32xf32>
    %c0_41 = arith.constant 0 : index
    %95 = arith.index_cast %c2_i32_36 : i32 to index
    %c0_42 = arith.constant 0 : index
    %96 = vector.load %arg6[%c0_41, %95, %c0_42] : memref<4x8x32xf32, #tpu.memory_space<vmem>>, vector<1x1x32xf32>
    %97 = vector.shape_cast %96 : vector<1x1x32xf32> to vector<1x32xf32>
    %98 = vector.shape_cast %94 : vector<1x32xf32> to vector<1x1x32xf32>
    tpu.vector_store %arg6[%c0_41, %95, %c0_42], %98 {strides = array<i32>} : memref<4x8x32xf32, #tpu.memory_space<vmem>>, vector<1x1x32xf32>,
    %c1_i32_43 = arith.constant 1 : i32
    %99 = arith.addi %88, %c1_i32_43 : i32
    %100 = arith.index_cast %99 : i32 to index
    %101 = memref.load %arg2[%100] : memref<64xi32, #tpu.memory_space<smem>>
    %c0_44 = arith.constant 0 : index
    %102 = arith.index_cast %101 : i32 to index
    %c0_45 = arith.constant 0 : index
    %103 = vector.load %arg4[%c0_44, %102, %c0_45] : memref<1x256x32xf32, #tpu.memory_space<vmem>>, vector<1x1x32xf32>
    %104 = vector.shape_cast %103 : vector<1x1x32xf32> to vector<1x32xf32>
    %c1_46 = arith.constant 1 : index
    %105 = arith.index_cast %c2_i32_36 : i32 to index
    %c0_47 = arith.constant 0 : index
    %106 = vector.load %arg6[%c1_46, %105, %c0_47] : memref<4x8x32xf32, #tpu.memory_space<vmem>>, vector<1x1x32xf32>
    %107 = vector.shape_cast %106 : vector<1x1x32xf32> to vector<1x32xf32>
    %108 = vector.shape_cast %104 : vector<1x32xf32> to vector<1x1x32xf32>
    tpu.vector_store %arg6[%c1_46, %105, %c0_47], %108 {strides = array<i32>} : memref<4x8x32xf32, #tpu.memory_space<vmem>>, vector<1x1x32xf32>,
    %c2_i32_48 = arith.constant 2 : i32
    %109 = arith.addi %88, %c2_i32_48 : i32
    %110 = arith.index_cast %109 : i32 to index
    %111 = memref.load %arg2[%110] : memref<64xi32, #tpu.memory_space<smem>>
    %c0_49 = arith.constant 0 : index
    %112 = arith.index_cast %111 : i32 to index
    %c0_50 = arith.constant 0 : index
    %113 = vector.load %arg4[%c0_49, %112, %c0_50] : memref<1x256x32xf32, #tpu.memory_space<vmem>>, vector<1x1x32xf32>
    %114 = vector.shape_cast %113 : vector<1x1x32xf32> to vector<1x32xf32>
    %c2_51 = arith.constant 2 : index
    %115 = arith.index_cast %c2_i32_36 : i32 to index
    %c0_52 = arith.constant 0 : index
    %116 = vector.load %arg6[%c2_51, %115, %c0_52] : memref<4x8x32xf32, #tpu.memory_space<vmem>>, vector<1x1x32xf32>
    %117 = vector.shape_cast %116 : vector<1x1x32xf32> to vector<1x32xf32>
    %118 = vector.shape_cast %114 : vector<1x32xf32> to vector<1x1x32xf32>
    tpu.vector_store %arg6[%c2_51, %115, %c0_52], %118 {strides = array<i32>} : memref<4x8x32xf32, #tpu.memory_space<vmem>>, vector<1x1x32xf32>,
    %c3_i32_53 = arith.constant 3 : i32
    %119 = arith.addi %88, %c3_i32_53 : i32
    %120 = arith.index_cast %119 : i32 to index
    %121 = memref.load %arg2[%120] : memref<64xi32, #tpu.memory_space<smem>>
    %c0_54 = arith.constant 0 : index
    %122 = arith.index_cast %121 : i32 to index
    %c0_55 = arith.constant 0 : index
    %123 = vector.load %arg4[%c0_54, %122, %c0_55] : memref<1x256x32xf32, #tpu.memory_space<vmem>>, vector<1x1x32xf32>
    %124 = vector.shape_cast %123 : vector<1x1x32xf32> to vector<1x32xf32>
    %c3_56 = arith.constant 3 : index
    %125 = arith.index_cast %c2_i32_36 : i32 to index
    %c0_57 = arith.constant 0 : index
    %126 = vector.load %arg6[%c3_56, %125, %c0_57] : memref<4x8x32xf32, #tpu.memory_space<vmem>>, vector<1x1x32xf32>
    %127 = vector.shape_cast %126 : vector<1x1x32xf32> to vector<1x32xf32>
    %128 = vector.shape_cast %124 : vector<1x32xf32> to vector<1x1x32xf32>
    tpu.vector_store %arg6[%c3_56, %125, %c0_57], %128 {strides = array<i32>} : memref<4x8x32xf32, #tpu.memory_space<vmem>>, vector<1x1x32xf32>,
    %c3_i32_58 = arith.constant 3 : i32
    %c4_i32_59 = arith.constant 4 : i32
    %129 = arith.muli %c3_i32_58, %c4_i32_59 : i32
    %130 = arith.addi %2, %129 : i32
    %c0_i32_60 = arith.constant 0 : i32
    %131 = arith.addi %130, %c0_i32_60 : i32
    %132 = arith.index_cast %131 : i32 to index
    %133 = memref.load %arg2[%132] : memref<64xi32, #tpu.memory_space<smem>>
    %c0_61 = arith.constant 0 : index
    %134 = arith.index_cast %133 : i32 to index
    %c0_62 = arith.constant 0 : index
    %135 = vector.load %arg4[%c0_61, %134, %c0_62] : memref<1x256x32xf32, #tpu.memory_space<vmem>>, vector<1x1x32xf32>
    %136 = vector.shape_cast %135 : vector<1x1x32xf32> to vector<1x32xf32>
    %c0_63 = arith.constant 0 : index
    %137 = arith.index_cast %c3_i32_58 : i32 to index
    %c0_64 = arith.constant 0 : index
    %138 = vector.load %arg6[%c0_63, %137, %c0_64] : memref<4x8x32xf32, #tpu.memory_space<vmem>>, vector<1x1x32xf32>
    %139 = vector.shape_cast %138 : vector<1x1x32xf32> to vector<1x32xf32>
    %140 = vector.shape_cast %136 : vector<1x32xf32> to vector<1x1x32xf32>
    tpu.vector_store %arg6[%c0_63, %137, %c0_64], %140 {strides = array<i32>} : memref<4x8x32xf32, #tpu.memory_space<vmem>>, vector<1x1x32xf32>,
    %c1_i32_65 = arith.constant 1 : i32
    %141 = arith.addi %130, %c1_i32_65 : i32
    %142 = arith.index_cast %141 : i32 to index
    %143 = memref.load %arg2[%142] : memref<64xi32, #tpu.memory_space<smem>>
    %c0_66 = arith.constant 0 : index
    %144 = arith.index_cast %143 : i32 to index
    %c0_67 = arith.constant 0 : index
    %145 = vector.load %arg4[%c0_66, %144, %c0_67] : memref<1x256x32xf32, #tpu.memory_space<vmem>>, vector<1x1x32xf32>
    %146 = vector.shape_cast %145 : vector<1x1x32xf32> to vector<1x32xf32>
    %c1_68 = arith.constant 1 : index
    %147 = arith.index_cast %c3_i32_58 : i32 to index
    %c0_69 = arith.constant 0 : index
    %148 = vector.load %arg6[%c1_68, %147, %c0_69] : memref<4x8x32xf32, #tpu.memory_space<vmem>>, vector<1x1x32xf32>
    %149 = vector.shape_cast %148 : vector<1x1x32xf32> to vector<1x32xf32>
    %150 = vector.shape_cast %146 : vector<1x32xf32> to vector<1x1x32xf32>
    tpu.vector_store %arg6[%c1_68, %147, %c0_69], %150 {strides = array<i32>} : memref<4x8x32xf32, #tpu.memory_space<vmem>>, vector<1x1x32xf32>,
    %c2_i32_70 = arith.constant 2 : i32
    %151 = arith.addi %130, %c2_i32_70 : i32
    %152 = arith.index_cast %151 : i32 to index
    %153 = memref.load %arg2[%152] : memref<64xi32, #tpu.memory_space<smem>>
    %c0_71 = arith.constant 0 : index
    %154 = arith.index_cast %153 : i32 to index
    %c0_72 = arith.constant 0 : index
    %155 = vector.load %arg4[%c0_71, %154, %c0_72] : memref<1x256x32xf32, #tpu.memory_space<vmem>>, vector<1x1x32xf32>
    %156 = vector.shape_cast %155 : vector<1x1x32xf32> to vector<1x32xf32>
    %c2_73 = arith.constant 2 : index
    %157 = arith.index_cast %c3_i32_58 : i32 to index
    %c0_74 = arith.constant 0 : index
    %158 = vector.load %arg6[%c2_73, %157, %c0_74] : memref<4x8x32xf32, #tpu.memory_space<vmem>>, vector<1x1x32xf32>
    %159 = vector.shape_cast %158 : vector<1x1x32xf32> to vector<1x32xf32>
    %160 = vector.shape_cast %156 : vector<1x32xf32> to vector<1x1x32xf32>
    tpu.vector_store %arg6[%c2_73, %157, %c0_74], %160 {strides = array<i32>} : memref<4x8x32xf32, #tpu.memory_space<vmem>>, vector<1x1x32xf32>,
    %c3_i32_75 = arith.constant 3 : i32
    %161 = arith.addi %130, %c3_i32_75 : i32
    %162 = arith.index_cast %161 : i32 to index
    %163 = memref.load %arg2[%162] : memref<64xi32, #tpu.memory_space<smem>>
    %c0_76 = arith.constant 0 : index
    %164 = arith.index_cast %163 : i32 to index
    %c0_77 = arith.constant 0 : index
    %165 = vector.load %arg4[%c0_76, %164, %c0_77] : memref<1x256x32xf32, #tpu.memory_space<vmem>>, vector<1x1x32xf32>
    %166 = vector.shape_cast %165 : vector<1x1x32xf32> to vector<1x32xf32>
    %c3_78 = arith.constant 3 : index
    %167 = arith.index_cast %c3_i32_58 : i32 to index
    %c0_79 = arith.constant 0 : index
    %168 = vector.load %arg6[%c3_78, %167, %c0_79] : memref<4x8x32xf32, #tpu.memory_space<vmem>>, vector<1x1x32xf32>
    %169 = vector.shape_cast %168 : vector<1x1x32xf32> to vector<1x32xf32>
    %170 = vector.shape_cast %166 : vector<1x32xf32> to vector<1x1x32xf32>
    tpu.vector_store %arg6[%c3_78, %167, %c0_79], %170 {strides = array<i32>} : memref<4x8x32xf32, #tpu.memory_space<vmem>>, vector<1x1x32xf32>,
    %c4_i32_80 = arith.constant 4 : i32
    %c4_i32_81 = arith.constant 4 : i32
    %171 = arith.muli %c4_i32_80, %c4_i32_81 : i32
    %172 = arith.addi %2, %171 : i32
    %c0_i32_82 = arith.constant 0 : i32
    %173 = arith.addi %172, %c0_i32_82 : i32
    %174 = arith.index_cast %173 : i32 to index
    %175 = memref.load %arg2[%174] : memref<64xi32, #tpu.memory_space<smem>>
    %c0_83 = arith.constant 0 : index
    %176 = arith.index_cast %175 : i32 to index
    %c0_84 = arith.constant 0 : index
    %177 = vector.load %arg4[%c0_83, %176, %c0_84] : memref<1x256x32xf32, #tpu.memory_space<vmem>>, vector<1x1x32xf32>
    %178 = vector.shape_cast %177 : vector<1x1x32xf32> to vector<1x32xf32>
    %c0_85 = arith.constant 0 : index
    %179 = arith.index_cast %c4_i32_80 : i32 to index
    %c0_86 = arith.constant 0 : index
    %180 = vector.load %arg6[%c0_85, %179, %c0_86] : memref<4x8x32xf32, #tpu.memory_space<vmem>>, vector<1x1x32xf32>
    %181 = vector.shape_cast %180 : vector<1x1x32xf32> to vector<1x32xf32>
    %182 = vector.shape_cast %178 : vector<1x32xf32> to vector<1x1x32xf32>
    tpu.vector_store %arg6[%c0_85, %179, %c0_86], %182 {strides = array<i32>} : memref<4x8x32xf32, #tpu.memory_space<vmem>>, vector<1x1x32xf32>,
    %c1_i32_87 = arith.constant 1 : i32
    %183 = arith.addi %172, %c1_i32_87 : i32
    %184 = arith.index_cast %183 : i32 to index
    %185 = memref.load %arg2[%184] : memref<64xi32, #tpu.memory_space<smem>>
    %c0_88 = arith.constant 0 : index
    %186 = arith.index_cast %185 : i32 to index
    %c0_89 = arith.constant 0 : index
    %187 = vector.load %arg4[%c0_88, %186, %c0_89] : memref<1x256x32xf32, #tpu.memory_space<vmem>>, vector<1x1x32xf32>
    %188 = vector.shape_cast %187 : vector<1x1x32xf32> to vector<1x32xf32>
    %c1_90 = arith.constant 1 : index
    %189 = arith.index_cast %c4_i32_80 : i32 to index
    %c0_91 = arith.constant 0 : index
    %190 = vector.load %arg6[%c1_90, %189, %c0_91] : memref<4x8x32xf32, #tpu.memory_space<vmem>>, vector<1x1x32xf32>
    %191 = vector.shape_cast %190 : vector<1x1x32xf32> to vector<1x32xf32>
    %192 = vector.shape_cast %188 : vector<1x32xf32> to vector<1x1x32xf32>
    tpu.vector_store %arg6[%c1_90, %189, %c0_91], %192 {strides = array<i32>} : memref<4x8x32xf32, #tpu.memory_space<vmem>>, vector<1x1x32xf32>,
    %c2_i32_92 = arith.constant 2 : i32
    %193 = arith.addi %172, %c2_i32_92 : i32
    %194 = arith.index_cast %193 : i32 to index
    %195 = memref.load %arg2[%194] : memref<64xi32, #tpu.memory_space<smem>>
    %c0_93 = arith.constant 0 : index
    %196 = arith.index_cast %195 : i32 to index
    %c0_94 = arith.constant 0 : index
    %197 = vector.load %arg4[%c0_93, %196, %c0_94] : memref<1x256x32xf32, #tpu.memory_space<vmem>>, vector<1x1x32xf32>
    %198 = vector.shape_cast %197 : vector<1x1x32xf32> to vector<1x32xf32>
    %c2_95 = arith.constant 2 : index
    %199 = arith.index_cast %c4_i32_80 : i32 to index
    %c0_96 = arith.constant 0 : index
    %200 = vector.load %arg6[%c2_95, %199, %c0_96] : memref<4x8x32xf32, #tpu.memory_space<vmem>>, vector<1x1x32xf32>
    %201 = vector.shape_cast %200 : vector<1x1x32xf32> to vector<1x32xf32>
    %202 = vector.shape_cast %198 : vector<1x32xf32> to vector<1x1x32xf32>
    tpu.vector_store %arg6[%c2_95, %199, %c0_96], %202 {strides = array<i32>} : memref<4x8x32xf32, #tpu.memory_space<vmem>>, vector<1x1x32xf32>,
    %c3_i32_97 = arith.constant 3 : i32
    %203 = arith.addi %172, %c3_i32_97 : i32
    %204 = arith.index_cast %203 : i32 to index
    %205 = memref.load %arg2[%204] : memref<64xi32, #tpu.memory_space<smem>>
    %c0_98 = arith.constant 0 : index
    %206 = arith.index_cast %205 : i32 to index
    %c0_99 = arith.constant 0 : index
    %207 = vector.load %arg4[%c0_98, %206, %c0_99] : memref<1x256x32xf32, #tpu.memory_space<vmem>>, vector<1x1x32xf32>
    %208 = vector.shape_cast %207 : vector<1x1x32xf32> to vector<1x32xf32>
    %c3_100 = arith.constant 3 : index
    %209 = arith.index_cast %c4_i32_80 : i32 to index
    %c0_101 = arith.constant 0 : index
    %210 = vector.load %arg6[%c3_100, %209, %c0_101] : memref<4x8x32xf32, #tpu.memory_space<vmem>>, vector<1x1x32xf32>
    %211 = vector.shape_cast %210 : vector<1x1x32xf32> to vector<1x32xf32>
    %212 = vector.shape_cast %208 : vector<1x32xf32> to vector<1x1x32xf32>
    tpu.vector_store %arg6[%c3_100, %209, %c0_101], %212 {strides = array<i32>} : memref<4x8x32xf32, #tpu.memory_space<vmem>>, vector<1x1x32xf32>,
    %c5_i32 = arith.constant 5 : i32
    %c4_i32_102 = arith.constant 4 : i32
    %213 = arith.muli %c5_i32, %c4_i32_102 : i32
    %214 = arith.addi %2, %213 : i32
    %c0_i32_103 = arith.constant 0 : i32
    %215 = arith.addi %214, %c0_i32_103 : i32
    %216 = arith.index_cast %215 : i32 to index
    %217 = memref.load %arg2[%216] : memref<64xi32, #tpu.memory_space<smem>>
    %c0_104 = arith.constant 0 : index
    %218 = arith.index_cast %217 : i32 to index
    %c0_105 = arith.constant 0 : index
    %219 = vector.load %arg4[%c0_104, %218, %c0_105] : memref<1x256x32xf32, #tpu.memory_space<vmem>>, vector<1x1x32xf32>
    %220 = vector.shape_cast %219 : vector<1x1x32xf32> to vector<1x32xf32>
    %c0_106 = arith.constant 0 : index
    %221 = arith.index_cast %c5_i32 : i32 to index
    %c0_107 = arith.constant 0 : index
    %222 = vector.load %arg6[%c0_106, %221, %c0_107] : memref<4x8x32xf32, #tpu.memory_space<vmem>>, vector<1x1x32xf32>
    %223 = vector.shape_cast %222 : vector<1x1x32xf32> to vector<1x32xf32>
    %224 = vector.shape_cast %220 : vector<1x32xf32> to vector<1x1x32xf32>
    tpu.vector_store %arg6[%c0_106, %221, %c0_107], %224 {strides = array<i32>} : memref<4x8x32xf32, #tpu.memory_space<vmem>>, vector<1x1x32xf32>,
    %c1_i32_108 = arith.constant 1 : i32
    %225 = arith.addi %214, %c1_i32_108 : i32
    %226 = arith.index_cast %225 : i32 to index
    %227 = memref.load %arg2[%226] : memref<64xi32, #tpu.memory_space<smem>>
    %c0_109 = arith.constant 0 : index
    %228 = arith.index_cast %227 : i32 to index
    %c0_110 = arith.constant 0 : index
    %229 = vector.load %arg4[%c0_109, %228, %c0_110] : memref<1x256x32xf32, #tpu.memory_space<vmem>>, vector<1x1x32xf32>
    %230 = vector.shape_cast %229 : vector<1x1x32xf32> to vector<1x32xf32>
    %c1_111 = arith.constant 1 : index
    %231 = arith.index_cast %c5_i32 : i32 to index
    %c0_112 = arith.constant 0 : index
    %232 = vector.load %arg6[%c1_111, %231, %c0_112] : memref<4x8x32xf32, #tpu.memory_space<vmem>>, vector<1x1x32xf32>
    %233 = vector.shape_cast %232 : vector<1x1x32xf32> to vector<1x32xf32>
    %234 = vector.shape_cast %230 : vector<1x32xf32> to vector<1x1x32xf32>
    tpu.vector_store %arg6[%c1_111, %231, %c0_112], %234 {strides = array<i32>} : memref<4x8x32xf32, #tpu.memory_space<vmem>>, vector<1x1x32xf32>,
    %c2_i32_113 = arith.constant 2 : i32
    %235 = arith.addi %214, %c2_i32_113 : i32
    %236 = arith.index_cast %235 : i32 to index
    %237 = memref.load %arg2[%236] : memref<64xi32, #tpu.memory_space<smem>>
    %c0_114 = arith.constant 0 : index
    %238 = arith.index_cast %237 : i32 to index
    %c0_115 = arith.constant 0 : index
    %239 = vector.load %arg4[%c0_114, %238, %c0_115] : memref<1x256x32xf32, #tpu.memory_space<vmem>>, vector<1x1x32xf32>
    %240 = vector.shape_cast %239 : vector<1x1x32xf32> to vector<1x32xf32>
    %c2_116 = arith.constant 2 : index
    %241 = arith.index_cast %c5_i32 : i32 to index
    %c0_117 = arith.constant 0 : index
    %242 = vector.load %arg6[%c2_116, %241, %c0_117] : memref<4x8x32xf32, #tpu.memory_space<vmem>>, vector<1x1x32xf32>
    %243 = vector.shape_cast %242 : vector<1x1x32xf32> to vector<1x32xf32>
    %244 = vector.shape_cast %240 : vector<1x32xf32> to vector<1x1x32xf32>
    tpu.vector_store %arg6[%c2_116, %241, %c0_117], %244 {strides = array<i32>} : memref<4x8x32xf32, #tpu.memory_space<vmem>>, vector<1x1x32xf32>,
    %c3_i32_118 = arith.constant 3 : i32
    %245 = arith.addi %214, %c3_i32_118 : i32
    %246 = arith.index_cast %245 : i32 to index
    %247 = memref.load %arg2[%246] : memref<64xi32, #tpu.memory_space<smem>>
    %c0_119 = arith.constant 0 : index
    %248 = arith.index_cast %247 : i32 to index
    %c0_120 = arith.constant 0 : index
    %249 = vector.load %arg4[%c0_119, %248, %c0_120] : memref<1x256x32xf32, #tpu.memory_space<vmem>>, vector<1x1x32xf32>
    %250 = vector.shape_cast %249 : vector<1x1x32xf32> to vector<1x32xf32>
    %c3_121 = arith.constant 3 : index
    %251 = arith.index_cast %c5_i32 : i32 to index
    %c0_122 = arith.constant 0 : index
    %252 = vector.load %arg6[%c3_121, %251, %c0_122] : memref<4x8x32xf32, #tpu.memory_space<vmem>>, vector<1x1x32xf32>
    %253 = vector.shape_cast %252 : vector<1x1x32xf32> to vector<1x32xf32>
    %254 = vector.shape_cast %250 : vector<1x32xf32> to vector<1x1x32xf32>
    tpu.vector_store %arg6[%c3_121, %251, %c0_122], %254 {strides = array<i32>} : memref<4x8x32xf32, #tpu.memory_space<vmem>>, vector<1x1x32xf32>,
    %c6_i32 = arith.constant 6 : i32
    %c4_i32_123 = arith.constant 4 : i32
    %255 = arith.muli %c6_i32, %c4_i32_123 : i32
    %256 = arith.addi %2, %255 : i32
    %c0_i32_124 = arith.constant 0 : i32
    %257 = arith.addi %256, %c0_i32_124 : i32
    %258 = arith.index_cast %257 : i32 to index
    %259 = memref.load %arg2[%258] : memref<64xi32, #tpu.memory_space<smem>>
    %c0_125 = arith.constant 0 : index
    %260 = arith.index_cast %259 : i32 to index
    %c0_126 = arith.constant 0 : index
    %261 = vector.load %arg4[%c0_125, %260, %c0_126] : memref<1x256x32xf32, #tpu.memory_space<vmem>>, vector<1x1x32xf32>
    %262 = vector.shape_cast %261 : vector<1x1x32xf32> to vector<1x32xf32>
    %c0_127 = arith.constant 0 : index
    %263 = arith.index_cast %c6_i32 : i32 to index
    %c0_128 = arith.constant 0 : index
    %264 = vector.load %arg6[%c0_127, %263, %c0_128] : memref<4x8x32xf32, #tpu.memory_space<vmem>>, vector<1x1x32xf32>
    %265 = vector.shape_cast %264 : vector<1x1x32xf32> to vector<1x32xf32>
    %266 = vector.shape_cast %262 : vector<1x32xf32> to vector<1x1x32xf32>
    tpu.vector_store %arg6[%c0_127, %263, %c0_128], %266 {strides = array<i32>} : memref<4x8x32xf32, #tpu.memory_space<vmem>>, vector<1x1x32xf32>,
    %c1_i32_129 = arith.constant 1 : i32
    %267 = arith.addi %256, %c1_i32_129 : i32
    %268 = arith.index_cast %267 : i32 to index
    %269 = memref.load %arg2[%268] : memref<64xi32, #tpu.memory_space<smem>>
    %c0_130 = arith.constant 0 : index
    %270 = arith.index_cast %269 : i32 to index
    %c0_131 = arith.constant 0 : index
    %271 = vector.load %arg4[%c0_130, %270, %c0_131] : memref<1x256x32xf32, #tpu.memory_space<vmem>>, vector<1x1x32xf32>
    %272 = vector.shape_cast %271 : vector<1x1x32xf32> to vector<1x32xf32>
    %c1_132 = arith.constant 1 : index
    %273 = arith.index_cast %c6_i32 : i32 to index
    %c0_133 = arith.constant 0 : index
    %274 = vector.load %arg6[%c1_132, %273, %c0_133] : memref<4x8x32xf32, #tpu.memory_space<vmem>>, vector<1x1x32xf32>
    %275 = vector.shape_cast %274 : vector<1x1x32xf32> to vector<1x32xf32>
    %276 = vector.shape_cast %272 : vector<1x32xf32> to vector<1x1x32xf32>
    tpu.vector_store %arg6[%c1_132, %273, %c0_133], %276 {strides = array<i32>} : memref<4x8x32xf32, #tpu.memory_space<vmem>>, vector<1x1x32xf32>,
    %c2_i32_134 = arith.constant 2 : i32
    %277 = arith.addi %256, %c2_i32_134 : i32
    %278 = arith.index_cast %277 : i32 to index
    %279 = memref.load %arg2[%278] : memref<64xi32, #tpu.memory_space<smem>>
    %c0_135 = arith.constant 0 : index
    %280 = arith.index_cast %279 : i32 to index
    %c0_136 = arith.constant 0 : index
    %281 = vector.load %arg4[%c0_135, %280, %c0_136] : memref<1x256x32xf32, #tpu.memory_space<vmem>>, vector<1x1x32xf32>
    %282 = vector.shape_cast %281 : vector<1x1x32xf32> to vector<1x32xf32>
    %c2_137 = arith.constant 2 : index
    %283 = arith.index_cast %c6_i32 : i32 to index
    %c0_138 = arith.constant 0 : index
    %284 = vector.load %arg6[%c2_137, %283, %c0_138] : memref<4x8x32xf32, #tpu.memory_space<vmem>>, vector<1x1x32xf32>
    %285 = vector.shape_cast %284 : vector<1x1x32xf32> to vector<1x32xf32>
    %286 = vector.shape_cast %282 : vector<1x32xf32> to vector<1x1x32xf32>
    tpu.vector_store %arg6[%c2_137, %283, %c0_138], %286 {strides = array<i32>} : memref<4x8x32xf32, #tpu.memory_space<vmem>>, vector<1x1x32xf32>,
    %c3_i32_139 = arith.constant 3 : i32
    %287 = arith.addi %256, %c3_i32_139 : i32
    %288 = arith.index_cast %287 : i32 to index
    %289 = memref.load %arg2[%288] : memref<64xi32, #tpu.memory_space<smem>>
    %c0_140 = arith.constant 0 : index
    %290 = arith.index_cast %289 : i32 to index
    %c0_141 = arith.constant 0 : index
    %291 = vector.load %arg4[%c0_140, %290, %c0_141] : memref<1x256x32xf32, #tpu.memory_space<vmem>>, vector<1x1x32xf32>
    %292 = vector.shape_cast %291 : vector<1x1x32xf32> to vector<1x32xf32>
    %c3_142 = arith.constant 3 : index
    %293 = arith.index_cast %c6_i32 : i32 to index
    %c0_143 = arith.constant 0 : index
    %294 = vector.load %arg6[%c3_142, %293, %c0_143] : memref<4x8x32xf32, #tpu.memory_space<vmem>>, vector<1x1x32xf32>
    %295 = vector.shape_cast %294 : vector<1x1x32xf32> to vector<1x32xf32>
    %296 = vector.shape_cast %292 : vector<1x32xf32> to vector<1x1x32xf32>
    tpu.vector_store %arg6[%c3_142, %293, %c0_143], %296 {strides = array<i32>} : memref<4x8x32xf32, #tpu.memory_space<vmem>>, vector<1x1x32xf32>,
    %c7_i32 = arith.constant 7 : i32
    %c4_i32_144 = arith.constant 4 : i32
    %297 = arith.muli %c7_i32, %c4_i32_144 : i32
    %298 = arith.addi %2, %297 : i32
    %c0_i32_145 = arith.constant 0 : i32
    %299 = arith.addi %298, %c0_i32_145 : i32
    %300 = arith.index_cast %299 : i32 to index
    %301 = memref.load %arg2[%300] : memref<64xi32, #tpu.memory_space<smem>>
    %c0_146 = arith.constant 0 : index
    %302 = arith.index_cast %301 : i32 to index
    %c0_147 = arith.constant 0 : index
    %303 = vector.load %arg4[%c0_146, %302, %c0_147] : memref<1x256x32xf32, #tpu.memory_space<vmem>>, vector<1x1x32xf32>
    %304 = vector.shape_cast %303 : vector<1x1x32xf32> to vector<1x32xf32>
    %c0_148 = arith.constant 0 : index
    %305 = arith.index_cast %c7_i32 : i32 to index
    %c0_149 = arith.constant 0 : index
    %306 = vector.load %arg6[%c0_148, %305, %c0_149] : memref<4x8x32xf32, #tpu.memory_space<vmem>>, vector<1x1x32xf32>
    %307 = vector.shape_cast %306 : vector<1x1x32xf32> to vector<1x32xf32>
    %308 = vector.shape_cast %304 : vector<1x32xf32> to vector<1x1x32xf32>
    tpu.vector_store %arg6[%c0_148, %305, %c0_149], %308 {strides = array<i32>} : memref<4x8x32xf32, #tpu.memory_space<vmem>>, vector<1x1x32xf32>,
    %c1_i32_150 = arith.constant 1 : i32
    %309 = arith.addi %298, %c1_i32_150 : i32
    %310 = arith.index_cast %309 : i32 to index
    %311 = memref.load %arg2[%310] : memref<64xi32, #tpu.memory_space<smem>>
    %c0_151 = arith.constant 0 : index
    %312 = arith.index_cast %311 : i32 to index
    %c0_152 = arith.constant 0 : index
    %313 = vector.load %arg4[%c0_151, %312, %c0_152] : memref<1x256x32xf32, #tpu.memory_space<vmem>>, vector<1x1x32xf32>
    %314 = vector.shape_cast %313 : vector<1x1x32xf32> to vector<1x32xf32>
    %c1_153 = arith.constant 1 : index
    %315 = arith.index_cast %c7_i32 : i32 to index
    %c0_154 = arith.constant 0 : index
    %316 = vector.load %arg6[%c1_153, %315, %c0_154] : memref<4x8x32xf32, #tpu.memory_space<vmem>>, vector<1x1x32xf32>
    %317 = vector.shape_cast %316 : vector<1x1x32xf32> to vector<1x32xf32>
    %318 = vector.shape_cast %314 : vector<1x32xf32> to vector<1x1x32xf32>
    tpu.vector_store %arg6[%c1_153, %315, %c0_154], %318 {strides = array<i32>} : memref<4x8x32xf32, #tpu.memory_space<vmem>>, vector<1x1x32xf32>,
    %c2_i32_155 = arith.constant 2 : i32
    %319 = arith.addi %298, %c2_i32_155 : i32
    %320 = arith.index_cast %319 : i32 to index
    %321 = memref.load %arg2[%320] : memref<64xi32, #tpu.memory_space<smem>>
    %c0_156 = arith.constant 0 : index
    %322 = arith.index_cast %321 : i32 to index
    %c0_157 = arith.constant 0 : index
    %323 = vector.load %arg4[%c0_156, %322, %c0_157] : memref<1x256x32xf32, #tpu.memory_space<vmem>>, vector<1x1x32xf32>
    %324 = vector.shape_cast %323 : vector<1x1x32xf32> to vector<1x32xf32>
    %c2_158 = arith.constant 2 : index
    %325 = arith.index_cast %c7_i32 : i32 to index
    %c0_159 = arith.constant 0 : index
    %326 = vector.load %arg6[%c2_158, %325, %c0_159] : memref<4x8x32xf32, #tpu.memory_space<vmem>>, vector<1x1x32xf32>
    %327 = vector.shape_cast %326 : vector<1x1x32xf32> to vector<1x32xf32>
    %328 = vector.shape_cast %324 : vector<1x32xf32> to vector<1x1x32xf32>
    tpu.vector_store %arg6[%c2_158, %325, %c0_159], %328 {strides = array<i32>} : memref<4x8x32xf32, #tpu.memory_space<vmem>>, vector<1x1x32xf32>,
    %c3_i32_160 = arith.constant 3 : i32
    %329 = arith.addi %298, %c3_i32_160 : i32
    %330 = arith.index_cast %329 : i32 to index
    %331 = memref.load %arg2[%330] : memref<64xi32, #tpu.memory_space<smem>>
    %c0_161 = arith.constant 0 : index
    %332 = arith.index_cast %331 : i32 to index
    %c0_162 = arith.constant 0 : index
    %333 = vector.load %arg4[%c0_161, %332, %c0_162] : memref<1x256x32xf32, #tpu.memory_space<vmem>>, vector<1x1x32xf32>
    %334 = vector.shape_cast %333 : vector<1x1x32xf32> to vector<1x32xf32>
    %c3_163 = arith.constant 3 : index
    %335 = arith.index_cast %c7_i32 : i32 to index
    %c0_164 = arith.constant 0 : index
    %336 = vector.load %arg6[%c3_163, %335, %c0_164] : memref<4x8x32xf32, #tpu.memory_space<vmem>>, vector<1x1x32xf32>
    %337 = vector.shape_cast %336 : vector<1x1x32xf32> to vector<1x32xf32>
    %338 = vector.shape_cast %334 : vector<1x32xf32> to vector<1x1x32xf32>
    tpu.vector_store %arg6[%c3_163, %335, %c0_164], %338 {strides = array<i32>} : memref<4x8x32xf32, #tpu.memory_space<vmem>>, vector<1x1x32xf32>,
    %c8_i32 = arith.constant 8 : i32
    %c0_165 = arith.constant 0 : index
    %c0_166 = arith.constant 0 : index
    %c0_167 = arith.constant 0 : index
    %339 = vector.load %arg3[%c0_165, %c0_166, %c0_167] : memref<1x8x4xf32, #tpu.memory_space<vmem>>, vector<1x8x4xf32>
    %340 = vector.shape_cast %339 : vector<1x8x4xf32> to vector<8x4xf32>
    %c0_168 = arith.constant 0 : index
    %c0_169 = arith.constant 0 : index
    %c0_170 = arith.constant 0 : index
    %341 = vector.load %arg6[%c0_168, %c0_169, %c0_170] : memref<4x8x32xf32, #tpu.memory_space<vmem>>, vector<1x8x32xf32>
    %342 = vector.shape_cast %341 : vector<1x8x32xf32> to vector<8x32xf32>
    %343 = vector.extract_strided_slice %340 {offsets = [0, 0], sizes = [8, 1], strides = [1, 1]} : vector<8x4xf32> to vector<8x1xf32>
    %344 = vector.broadcast %343 : vector<8x1xf32> to vector<8x32xf32>
    %345 = arith.mulf %342, %344 : vector<8x32xf32>
    %c1_171 = arith.constant 1 : index
    %c0_172 = arith.constant 0 : index
    %c0_173 = arith.constant 0 : index
    %346 = vector.load %arg6[%c1_171, %c0_172, %c0_173] : memref<4x8x32xf32, #tpu.memory_space<vmem>>, vector<1x8x32xf32>
    %347 = vector.shape_cast %346 : vector<1x8x32xf32> to vector<8x32xf32>
    %348 = vector.extract_strided_slice %340 {offsets = [0, 1], sizes = [8, 1], strides = [1, 1]} : vector<8x4xf32> to vector<8x1xf32>
    %349 = vector.broadcast %348 : vector<8x1xf32> to vector<8x32xf32>
    %350 = arith.mulf %347, %349 : vector<8x32xf32>
    %351 = arith.addf %345, %350 : vector<8x32xf32>
    %c2_174 = arith.constant 2 : index
    %c0_175 = arith.constant 0 : index
    %c0_176 = arith.constant 0 : index
    %352 = vector.load %arg6[%c2_174, %c0_175, %c0_176] : memref<4x8x32xf32, #tpu.memory_space<vmem>>, vector<1x8x32xf32>
    %353 = vector.shape_cast %352 : vector<1x8x32xf32> to vector<8x32xf32>
    %354 = vector.extract_strided_slice %340 {offsets = [0, 2], sizes = [8, 1], strides = [1, 1]} : vector<8x4xf32> to vector<8x1xf32>
    %355 = vector.broadcast %354 : vector<8x1xf32> to vector<8x32xf32>
    %356 = arith.mulf %353, %355 : vector<8x32xf32>
    %357 = arith.addf %351, %356 : vector<8x32xf32>
    %c3_177 = arith.constant 3 : index
    %c0_178 = arith.constant 0 : index
    %c0_179 = arith.constant 0 : index
    %358 = vector.load %arg6[%c3_177, %c0_178, %c0_179] : memref<4x8x32xf32, #tpu.memory_space<vmem>>, vector<1x8x32xf32>
    %359 = vector.shape_cast %358 : vector<1x8x32xf32> to vector<8x32xf32>
    %360 = vector.extract_strided_slice %340 {offsets = [0, 3], sizes = [8, 1], strides = [1, 1]} : vector<8x4xf32> to vector<8x1xf32>
    %361 = vector.broadcast %360 : vector<8x1xf32> to vector<8x32xf32>
    %362 = arith.mulf %359, %361 : vector<8x32xf32>
    %363 = arith.addf %357, %362 : vector<8x32xf32>
    %c0_180 = arith.constant 0 : index
    %c0_181 = arith.constant 0 : index
    %c0_182 = arith.constant 0 : index
    %364 = vector.load %arg5[%c0_180, %c0_181, %c0_182] : memref<1x8x32xf32, #tpu.memory_space<vmem>>, vector<1x8x32xf32>
    %365 = vector.shape_cast %364 : vector<1x8x32xf32> to vector<8x32xf32>
    %366 = vector.shape_cast %363 : vector<8x32xf32> to vector<1x8x32xf32>
    tpu.vector_store %arg5[%c0_180, %c0_181, %c0_182], %366 {strides = array<i32>} : memref<1x8x32xf32, #tpu.memory_space<vmem>>, vector<1x8x32xf32>,
    return
  }
  func.func @transform_0(%arg0: i32, %arg1: i32, %arg2: memref<64xi32, #tpu.memory_space<smem>>) -> (i32, i32, i32) {
    %c0_i32 = arith.constant 0 : i32
    %c0_i32_0 = arith.constant 0 : i32
    return %arg0, %arg1, %c0_i32 : i32, i32, i32
  }
  func.func @transform_1(%arg0: i32, %arg1: i32, %arg2: memref<64xi32, #tpu.memory_space<smem>>) -> (i32, i32, i32) {
    %c0_i32 = arith.constant 0 : i32
    %c0_i32_0 = arith.constant 0 : i32
    %c0_i32_1 = arith.constant 0 : i32
    return %arg0, %c0_i32, %c0_i32_0 : i32, i32, i32
  }
  func.func @transform_2(%arg0: i32, %arg1: i32, %arg2: memref<64xi32, #tpu.memory_space<smem>>) -> (i32, i32, i32) {
    %c0_i32 = arith.constant 0 : i32
    %c0_i32_0 = arith.constant 0 : i32
    return %arg0, %arg1, %c0_i32 : i32, i32, i32
  }
}

</mosaic_0001>

<bundles_post_ra>
// kernel: a_call__.1
= control target key start
LH: loop header
LB: loop body
LE: loop exit
PB: predicated region body
PF: predicated region fallthrough
CT: control target
= control target key end

     0   :  { %s773_s15 = smov [#allocation4]   ;;  %s1180_s0 = inlined_call_operand.vmem [shape: s32[64], index: 0, kind: input, shape index: {}]   ;;  %s1181_s1 = inlined_call_operand.vmem [shape: f32[2,8,4], index: 1, kind: input, shape index: {}]   ;;  %s1182_s2 = inlined_call_operand.hbm [shape: f32[2,256,32], index: 2, kind: input, shape index: {}]   ;;  %s1183_s3 = inlined_call_operand.hbm [shape: f32[2,8,32], index: 3, kind: output, shape index: {}]  }
   0x1   :  { %1196 = sst [smem:[#allocation22_spill]] %s1181_s1  ;;  %s9_s14 = sshll.u32 %s1180_s0, 4  ;;  %s10_s14 = int_to_ptr.vmem [resolvable:$true] %s9_s14 }
   0x2   :  { %1197 = sst [smem:[#allocation23_spill]] %s1182_s2 }
   0x3   :  { %1198 = sst [smem:[#allocation24_spill]] %s1183_s3 }
   0x4   :  { %12 = dma.vmem_to_smem %s10_s14, 16, %s773_s15, [#allocation3] }
   0x5   :  { %739 = dma.done.wait [#allocation3], 16 }
   0x6   :  { %740 = vsyncadd [#allocation3], 4294967280 }
   0x7   :  { %15 = sfence }
   0x8   :  { %16 = vsyncpa [#allocation6], 0 }
   0x9   :  { %18 = vsyncpa [#allocation6 + $0x1], 0 }
   0xa   :  { %19 = vsyncpa [#allocation7], 0 }
   0xb   :  { %21 = vsyncpa [#allocation7 + $0x1], 0  ;;  %s803_s16 = smov 0   ;;  %s805_s17 = smov 0  }
   0xc   :  { %s807_s18 = smov 0   ;;  %s809_s19 = smov 0  }
   0xd   :  { %s811_s20 = smov 0   ;;  %s813_s0 = smov 0  }
   0xe LB: > { %1199 = sst [smem:[#allocation12_spill]] %s751_s16  ;;  %s554_s21 = sadd.s32 4294967295, %s771_s0   ;;  %s771_s0 = sphi %s813_s0, %s27_s0   ;;  %s767_s20 = sphi %s811_s20, %s1238_s20   ;;  %s763_s19 = sphi %s809_s19, %s1237_s19   ;;  %s759_s18 = sphi %s807_s18, %s1236_s18   ;;  %s755_s17 = sphi %s805_s17, %s1235_s17   ;;  %s751_s16 = sphi %s803_s16, %s1234_s16  }
   0xf   : > { %1200 = sst [smem:[#allocation13_spill]] %s755_s17  ;;  %s555_s22 = sadd.s32 4294967294, %s771_s0  }
  0x10   : > { %1201 = sst [smem:[#allocation14_spill]] %s759_s18  ;;  %s39_s23 = sadd.s32 1, %s767_s20 }
  0x11   : > { %1202 = sst [smem:[#allocation15_spill]] %s763_s19  ;;  %s74_s24 = sadd.s32 1, %s759_s18 }
  0x12   : > { %1203 = sst [smem:[#allocation16_spill]] %s767_s20  ;;  %p41_p0 = scmp.ge.s32.totalorder %s39_s23, 2 }
  0x13   : > { %1204 = sst [smem:[#allocation17_spill]] %s771_s0  ;;  %p81_p1 = scmp.ne.s32.totalorder %s759_s18, %s755_s17 }
  0x14   : > { %p82_p2 = scmp.eq.s32.totalorder %s771_s0, 0  ;;  %p87_p3 = scmp.ne.s32.totalorder %s755_s17, %s751_s16 }
  0x15   : > { %s1240_s23 = smov (%p41_p0, %s39_s23), 0  ;;  %p88_p5 = scmp.eq.s32.totalorder %s554_s21, 0 }
  0x16   : > { %1205 = sst [smem:[#allocation18_spill]] %s1240_s23  ;;  %p844_p4 = por %p82_p2, %p81_p1 }
  0x17   : > { %s71_s26 = ssub.s32 %s767_s20, %s1240_s23  ;;  %p113_p6 = scmp.eq.s32.totalorder %s554_s21, 1 }
  0x18   : > { %p72_p7 = scmp.eq.s32.totalorder %s71_s26, 0  ;;  %p850_p8 = por %p88_p5, %p87_p3 }
  0x19   : > { %p854_p9 = por %p113_p6, %p81_p1  ;;  %p119_p10 = scmp.eq.s32.totalorder %s555_s22, 1 }
  0x1a   : > { %s859_s29 = scalar_select %p72_p7, %s759_s18, %s74_s24  }
  0x1b   : > { %s1208_s28 = scalar_select %p854_p9, 1, 0 }
  0x1c   : > { %1210 = sst [smem:[#allocation20_spill]] %s859_s29  ;;  %p861_p11 = por %p119_p10, %p87_p3 }
  0x1d   : > { %1209 = sst [smem:[#allocation19_spill]] %s1208_s28  ;;  %p557_p12 = scmp.ge.s32.totalorder %s771_s0, 2 }
  0x1e   : > { %s1211_s30 = scalar_select %p861_p11, 1, 0 }
  0x1f   : > { %p583_p13 = scmp.lt.s32.totalorder %s771_s0, 2  ;;  %s149_s4 = sand.u32 1, %s759_s18  }
  0x20   : > { %1212 = sst [smem:[#allocation21_spill]] %s1211_s30  ;;  %s558_s5 = sshll.u32 %s149_s4, 8 }
  0x21   : > { %s570_s6 = sshll.u32 %s767_s20, 8  ;;  %s1213_s2 = sld [smem:[#allocation23_spill]] }
  0x22   : > { %s153_s10 = scalar_lea.vmem [#allocation5], %s558_s5  ;;  %p576_p0 = pnand %p583_p13, %p844_p4 }
  0x23   : > { %s161_s11 = sshll.u32 %s153_s10, 4  ;;  %p561_p1 = scmp.ge.s32.totalorder %s771_s0, 1  ;;  %s162_s11 = int_to_ptr.vmem [resolvable:$true] %s161_s11 }
  0x24   : > { %s150_s13 = scalar_lea.sflag [#allocation6], %s149_s4  ;;  %s774_s14 = smov 128  }
  0x25   : > { %s775_s15 = smov 8   ;;  %p169_p2 = scmp.lt.s32.totalorder %s771_s0, 3 }
  0x27   : > { %s158_s9 = scalar_lea.hbm %s1213_s2, %s570_s6  ;;  %p170_p3 = pnand %p561_p1, %p169_p2 }
  0x28   : > { %s159_s12 = sshll.u32 %s158_s9, 4  ;;  %s877_s21 = sand.u32 (!%p170_p3), 1, %s755_s17   ;;  %s160_s12 = int_to_ptr.hbm [resolvable:$true] %s159_s12 }
  0x29   : > { %578 = dma.hbm_to_vmem [thread:$0]  (!%p576_p0), %s160_s12, 4096, %s162_s11, %s150_s13, %s774_s14, %s774_s14, %s775_s15  }
  0x2a   : > { %173 = sbr.rel (%p170_p3) target bundleno = 191 (0xbf), region = 28  ;;  %s562_s22 = sshll.u32 (!%p170_p3), %s877_s21, 8 }
  0x2b   : > { %s176_s24 = scalar_lea.sflag (!%p170_p3), [#allocation6], %s877_s21  ;;  %s881_s26 = scalar_lea.vmem (!%p170_p3), [#allocation5], %s562_s22 }
  0x2f   : > { %742 = dma.done.wait (%p850_p8), %s176_s24, 4096  }
  0x30   : > { %744 = vsyncadd (%p850_p8), %s176_s24, 4294963200  ;;  %p208_p4 = scmp.lt.s32.totalorder %s763_s19, 1  ;;  %v776_v0 = vmov 0   ;;  %v777_v1 = vmov 2   ;;  %s1214_s1 = sld [smem:[#allocation22_spill]]  ;;  %v778_v3 = vmov 1  }
  0x31   : > { %640 = vset.pattern.permute.xlu0 %v776_v0  ;;  %642 = vset.pattern.permute.xlu1 %v777_v1  ;;  %v779_v4 = vmov 3   ;;  %s893_s27 = sshll.u32 %s763_s19, 5  ;;  %vm220_vm0 = vcmask 253952   ;;  %vm409_vm1 = vcmask 261120  }
  0x32   : > { %s209_s25 = scalar_select %p208_p4, %s763_s19, 1 }
  0x33   : > { %s240_s8 = sadd.s32 4, %s893_s27  ;;  %s260_s9 = sadd.s32 8, %s893_s27 }
  0x34   : > { %s564_s4 = sshll.u32 %s209_s25, 3  ;;  %s898_s10 = sld [smem:[#allocation4 + %s893_s27]] }
  0x35   : > { %s280_s11 = sadd.s32 12, %s893_s27  ;;  %s901_s12 = sld [smem:[#allocation4 + %s240_s8]] }
  0x36   : > { %s214_s7 = scalar_lea.vmem %s1214_s1, %s564_s4  ;;  %s300_s13 = sadd.s32 16, %s893_s27 }
  0x37   : > { %v380_v2 = vld [vmem:[%s214_s7] sm:$0xff]  ;;  %s904_s14 = sld [smem:[#allocation4 + %s260_s9]]  ;;  %s320_s15 = sadd.s32 20, %s893_s27 }
  0x38   : > { %384 = vperm.xlu0 %640, %v380_v2   ;;  %397 = vperm.xlu1 %642, %v380_v2   ;;  %s340_s22 = sadd.s32 24, %s893_s27  ;;  %s360_s24 = sadd.s32 28, %s893_s27 }
  0x39   : > { %s909_s25 = sld [smem:[#allocation4 + %s280_s11]]  ;;  %s228_s4 = sadd.s32 2, %s893_s27 }
  0x3a   : > { %s250_s5 = sadd.s32 6, %s893_s27  ;;  %s913_s6 = sld [smem:[#allocation4 + %s300_s13]] }
  0x3b   : > { %s270_s7 = sadd.s32 10, %s893_s27  ;;  %s916_s8 = sld [smem:[#allocation4 + %s320_s15]] }
  0x3c   : > { %s290_s9 = sadd.s32 14, %s893_s27  ;;  %s919_s1 = sld [smem:[#allocation4 + %s340_s22]] }
  0x3d   : > { %s310_s11 = sadd.s32 18, %s893_s27  ;;  %s924_s23 = sld [smem:[#allocation4 + %s360_s24]] }
  0x3e   : > { %s330_s29 = sadd.s32 22, %s893_s27  ;;  %s931_s15 = sld [smem:[#allocation4 + %s228_s4]] }
  0x3f   : > { %s935_s22 = sld [smem:[#allocation4 + %s250_s5]]  ;;  %s350_s17 = sadd.s32 26, %s893_s27 }
  0x40   : > { %641 = vset.pattern.permute.xlu0 %v778_v3  ;;  %643 = vset.pattern.permute.xlu1 %v779_v4  ;;  %s938_s2 = sld [smem:[#allocation4 + %s270_s7]]  ;;  %s370_s13 = sadd.s32 30, %s893_s27 }
  0x41   : > { %390 = vperm.xlu0 %641, %v380_v2   ;;  %404 = vperm.xlu1 %643, %v380_v2   ;;  %s945_s4 = sld [smem:[#allocation4 + %s290_s9]]  ;;  %s222_s24 = sadd.s32 1, %s893_s27 }
  0x42   : > { %s949_s0 = sld [smem:[#allocation4 + %s310_s11]]  ;;  %s245_s20 = sadd.s32 5, %s893_s27 }
  0x43   : > { %s953_s7 = sld [smem:[#allocation4 + %s330_s29]]  ;;  %s265_s18 = sadd.s32 9, %s893_s27 }
  0x44   : > { %s957_s9 = sld [smem:[#allocation4 + %s350_s17]]  ;;  %s285_s16 = sadd.s32 13, %s893_s27 }
  0x45   : > { %s962_s5 = sld [smem:[#allocation4 + %s370_s13]]  ;;  %s305_s28 = sadd.s32 17, %s893_s27 }
  0x46   : > { %s971_s17 = sld [smem:[#allocation4 + %s222_s24]]  ;;  %s1215_s19 = scalar_lea.vmem %s881_s26, %s898_s10 [#allocation5] }
  0x47   : > { %v219_v5 = vld [vmem:[%s1215_s19] sm:$0x1]  ;;  %s1216_s11 = scalar_lea.vmem %s881_s26, %s901_s12 [#allocation5]  ;;  %s1217_s13 = scalar_lea.vmem %s881_s26, %s904_s14 [#allocation5] }
  0x48   : > { %v243_v6 = vld [vmem:[%s1216_s11] sm:$0x1]  ;;  %s292_s30 = scalar_lea.vmem %s881_s26, %s945_s4 [#allocation5]  ;;  %s312_s29 = scalar_lea.vmem %s881_s26, %s949_s0 [#allocation5]  ;;  %221 = vst.msk [vmem:[#allocation2] sm:$0x1] %vm220_vm0, %v219_v5 }
  0x49   : > { %644 = vset.pattern.permute.xlu0 %v779_v4  ;;  %v263_v7 = vld [vmem:[%s1217_s13] sm:$0x1]  ;;  %s1218_s3 = scalar_lea.vmem %s881_s26, %s909_s25 [#allocation5]  ;;  %s332_s10 = scalar_lea.vmem %s881_s26, %s953_s7 [#allocation5]  ;;  %244 = vst.msk [vmem:[#allocation2 + $0x1] sm:$0x1] %vm220_vm0, %v243_v6 }
  0x4a   : > { %v283_v8 = vld [vmem:[%s1218_s3] sm:$0x1]  ;;  %s992_s19 = sld [smem:[#allocation4 + %s245_s20]]  ;;  %s1219_s12 = scalar_lea.vmem %s881_s26, %s913_s6 [#allocation5]  ;;  %264 = vst.msk [vmem:[#allocation2 + $0x2] sm:$0x1] %vm220_vm0, %v263_v7 }
  0x4b   : > { %v303_v9 = vld [vmem:[%s1219_s12] sm:$0x1]  ;;  %s345_s14 = sadd.s32 25, %s893_s27  ;;  %s999_s24 = sld [smem:[#allocation4 + %s265_s18]]  ;;  %284 = vst.msk [vmem:[#allocation2 + $0x3] sm:$0x1] %vm220_vm0, %v283_v8 }
  0x4c   : > { %s1220_s3 = scalar_lea.vmem %s881_s26, %s916_s8 [#allocation5]  ;;  %s352_s20 = scalar_lea.vmem %s881_s26, %s957_s9 [#allocation5]  ;;  %304 = vst.msk [vmem:[#allocation2 + $0x4] sm:$0x1] %vm220_vm0, %v303_v9  ;;  %v293_v16 = vld [vmem:[%s292_s30] sm:$0x1] }
  0x4d   : > { %v323_v10 = vld [vmem:[%s1220_s3] sm:$0x1]  ;;  %s365_s25 = sadd.s32 29, %s893_s27  ;;  %s1221_s6 = scalar_lea.vmem %s881_s26, %s919_s1 [#allocation5]  ;;  %294 = vst.msk [vmem:[#allocation2 + $0x13] sm:$0x1] %vm220_vm0, %v293_v16 }
  0x4e   : > { %v343_v11 = vld [vmem:[%s1221_s6] sm:$0x1]  ;;  %s1014_s18 = sld [smem:[#allocation4 + %s285_s16]]  ;;  %s1222_s8 = scalar_lea.vmem %s881_s26, %s924_s23 [#allocation5]  ;;  %324 = vst.msk [vmem:[#allocation2 + $0x5] sm:$0x1] %vm220_vm0, %v323_v10 }
  0x4f   : > { %v363_v12 = vld [vmem:[%s1222_s8] sm:$0x1]  ;;  %s234_s13 = sadd.s32 3, %s893_s27  ;;  %s255_s12 = sadd.s32 7, %s893_s27  ;;  %344 = vst.msk [vmem:[#allocation2 + $0x6] sm:$0x1] %vm220_vm0, %v343_v11 }
  0x50   : > { %s1223_s1 = scalar_lea.vmem %s881_s26, %s931_s15 [#allocation5]  ;;  %s1028_s16 = sld [smem:[#allocation4 + %s305_s28]]  ;;  %364 = vst.msk [vmem:[#allocation2 + $0x7] sm:$0x1] %vm220_vm0, %v363_v12  ;;  %v313_v17 = vld [vmem:[%s312_s29] sm:$0x1] }
  0x51   : > { %v231_v13 = vld [vmem:[%s1223_s1] sm:$0x1]  ;;  %s275_s23 = sadd.s32 11, %s893_s27  ;;  %s1224_s3 = scalar_lea.vmem %s881_s26, %s935_s22 [#allocation5]  ;;  %314 = vst.msk [vmem:[#allocation2 + $0x14] sm:$0x1] %vm220_vm0, %v313_v17 }
  0x52   : > { %v253_v14 = vld [vmem:[%s1224_s3] sm:$0x1]  ;;  %s1225_s6 = sadd.s32 21, %s893_s27  ;;  %s295_s15 = sadd.s32 15, %s893_s27  ;;  %233 = vst.msk [vmem:[#allocation2 + $0x10] sm:$0x1] %vm220_vm0, %v231_v13 }
  0x53   : > { %s1037_s8 = sld [smem:[#allocation4 + %s1225_s6]]  ;;  %s1226_s1 = scalar_lea.vmem %s881_s26, %s938_s2 [#allocation5]  ;;  %254 = vst.msk [vmem:[#allocation2 + $0x11] sm:$0x1] %vm220_vm0, %v253_v14  ;;  %v333_v18 = vld [vmem:[%s332_s10] sm:$0x1] }
  0x54   : > { %v273_v15 = vld [vmem:[%s1226_s1] sm:$0x1]  ;;  %s224_s28 = scalar_lea.vmem %s881_s26, %s971_s17 [#allocation5]  ;;  %s315_s11 = sadd.s32 19, %s893_s27  ;;  %334 = vst.msk [vmem:[#allocation2 + $0x15] sm:$0x1] %vm220_vm0, %v333_v18 }
  0x55   : > { %s247_s22 = scalar_lea.vmem %s881_s26, %s992_s19 [#allocation5]  ;;  %s1055_s3 = sld [smem:[#allocation4 + %s345_s14]]  ;;  %274 = vst.msk [vmem:[#allocation2 + $0x12] sm:$0x1] %vm220_vm0, %v273_v15  ;;  %v353_v19 = vld [vmem:[%s352_s20] sm:$0x1] }
  0x56   : > { %s267_s2 = scalar_lea.vmem %s881_s26, %s999_s24 [#allocation5]  ;;  %s1063_s17 = sld [smem:[#allocation4 + %s365_s25]]  ;;  %v225_v21 = vld [vmem:[%s224_s28] sm:$0x1]  ;;  %354 = vst.msk [vmem:[#allocation2 + $0x16] sm:$0x1] %vm220_vm0, %v353_v19 }
  0x57   : > { %s335_s30 = sadd.s32 23, %s893_s27  ;;  %s1070_s4 = sld [smem:[#allocation4 + %s234_s13]]  ;;  %v248_v22 = vld [vmem:[%s247_s22] sm:$0x1]  ;;  %227 = vst.msk [vmem:[#allocation2 + $0x8] sm:$0x1] %vm220_vm0, %v225_v21 }
  0x58   : > { %s287_s19 = scalar_lea.vmem %s881_s26, %s1014_s18 [#allocation5]  ;;  %s1078_s0 = sld [smem:[#allocation4 + %s255_s12]]  ;;  %v268_v23 = vld [vmem:[%s267_s2] sm:$0x1]  ;;  %249 = vst.msk [vmem:[#allocation2 + $0x9] sm:$0x1] %vm220_vm0, %v248_v22 }
  0x59   : > { %s1227_s29 = scalar_lea.vmem %s881_s26, %s962_s5 [#allocation5]  ;;  %s355_s14 = sadd.s32 27, %s893_s27  ;;  %v288_v24 = vld [vmem:[%s287_s19] sm:$0x1]  ;;  %269 = vst.msk [vmem:[#allocation2 + $0xa] sm:$0x1] %vm220_vm0, %v268_v23 }
  0x5a   : > { %v373_v20 = vld [vmem:[%s1227_s29] sm:$0x1]  ;;  %s1085_s7 = sld [smem:[#allocation4 + %s275_s23]]  ;;  %s307_s10 = scalar_lea.vmem %s881_s26, %s1028_s16 [#allocation5]  ;;  %289 = vst.msk [vmem:[#allocation2 + $0xb] sm:$0x1] %vm220_vm0, %v288_v24 }
  0x5b   : > { %s1090_s9 = sld [smem:[#allocation4 + %s295_s15]]  ;;  %s375_s24 = sadd.s32 31, %s893_s27  ;;  %374 = vst.msk [vmem:[#allocation2 + $0x17] sm:$0x1] %vm220_vm0, %v373_v20  ;;  %v308_v25 = vld [vmem:[%s307_s10] sm:$0x1] }
  0x5c   : > { %s1094_s5 = sld [smem:[#allocation4 + %s315_s11]]  ;;  %s327_s20 = scalar_lea.vmem %s881_s26, %s1037_s8 [#allocation5]  ;;  %309 = vst.msk [vmem:[#allocation2 + $0xc] sm:$0x1] %vm220_vm0, %v308_v25  ;;  %v381_v39 = vld [vmem:[#allocation2] sm:$0xff] }
  0x5d   : > { %s1099_s25 = sld [smem:[#allocation4 + %s335_s30]]  ;;  %s347_s18 = scalar_lea.vmem %s881_s26, %s1055_s3 [#allocation5]  ;;  %v328_v26 = vld [vmem:[%s327_s20] sm:$0x1] }
  0x5e   : > { %s1104_s13 = sld [smem:[#allocation4 + %s355_s14]]  ;;  %s367_s27 = scalar_lea.vmem %s881_s26, %s1063_s17 [#allocation5]  ;;  %v348_v27 = vld [vmem:[%s347_s18] sm:$0x1]  ;;  %329 = vst.msk [vmem:[#allocation2 + $0xd] sm:$0x1] %vm220_vm0, %v328_v26 }
  0x5f   : > { %s1109_s11 = sld [smem:[#allocation4 + %s375_s24]]  ;;  %s236_s12 = scalar_lea.vmem %s881_s26, %s1070_s4 [#allocation5]  ;;  %v368_v28 = vld [vmem:[%s367_s27] sm:$0x1]  ;;  %349 = vst.msk [vmem:[#allocation2 + $0xe] sm:$0x1] %vm220_vm0, %v348_v27 }
  0x60   : > { %s257_s16 = scalar_lea.vmem %s881_s26, %s1078_s0 [#allocation5]  ;;  %s277_s23 = scalar_lea.vmem %s881_s26, %s1085_s7 [#allocation5]  ;;  %v237_v29 = vld [vmem:[%s236_s12] sm:$0x1]  ;;  %369 = vst.msk [vmem:[#allocation2 + $0xf] sm:$0x1] %vm220_vm0, %v368_v28 }
  0x61   : > { %s297_s6 = scalar_lea.vmem %s881_s26, %s1090_s9 [#allocation5]  ;;  %v258_v30 = vld [vmem:[%s257_s16] sm:$0x1]  ;;  %239 = vst.msk [vmem:[#allocation2 + $0x18] sm:$0x1] %vm220_vm0, %v237_v29  ;;  %s1228_s28 = sld [smem:[#allocation15_spill]] }
  0x62   : > { %s317_s8 = scalar_lea.vmem %s881_s26, %s1094_s5 [#allocation5]  ;;  %v278_v31 = vld [vmem:[%s277_s23] sm:$0x1]  ;;  %259 = vst.msk [vmem:[#allocation2 + $0x19] sm:$0x1] %vm220_vm0, %v258_v30  ;;  %v395_v41 = vld [vmem:[#allocation2 + $0x10] sm:$0xff]  ;;  %s1229_s30 = sld [smem:[#allocation24_spill]] }
  0x63   : > { %s337_s15 = scalar_lea.vmem %s881_s26, %s1099_s25 [#allocation5]  ;;  %v298_v32 = vld [vmem:[%s297_s6] sm:$0x1]  ;;  %279 = vst.msk [vmem:[#allocation2 + $0x1a] sm:$0x1] %vm220_vm0, %v278_v31  ;;  %s412_s7 = scalar_lea.sflag [#allocation7], %s877_s21 }
  0x64   : > { %s357_s1 = scalar_lea.vmem %s881_s26, %s1104_s13 [#allocation5]  ;;  %v318_v33 = vld [vmem:[%s317_s8] sm:$0x1]  ;;  %299 = vst.msk [vmem:[#allocation2 + $0x1b] sm:$0x1] %vm220_vm0, %v298_v32 }
  0x65   : > { %s377_s22 = scalar_lea.vmem %s881_s26, %s1109_s11 [#allocation5]  ;;  %v338_v34 = vld [vmem:[%s337_s15] sm:$0x1]  ;;  %319 = vst.msk [vmem:[#allocation2 + $0x1c] sm:$0x1] %vm220_vm0, %v318_v33  ;;  %s563_s26 = sshll.u32 %s877_s21, 3 }
  0x66   : > { %v358_v35 = vld [vmem:[%s357_s1] sm:$0x1]  ;;  %339 = vst.msk [vmem:[#allocation2 + $0x1d] sm:$0x1] %vm220_vm0, %v338_v34  ;;  %s207_s0 = scalar_lea.vmem [#allocation8], %s563_s26 }
  0x67   : > { %v378_v36 = vld [vmem:[%s377_s22] sm:$0x1]  ;;  %359 = vst.msk [vmem:[#allocation2 + $0x1e] sm:$0x1] %vm220_vm0, %v358_v35  ;;  %v388_v40 = vld [vmem:[#allocation2 + $0x8] sm:$0xff]  ;;  %s567_s3 = sshll.u32 %s1228_s28, 3 }
  0x68   : > { %379 = vst.msk [vmem:[#allocation2 + $0x1f] sm:$0x1] %vm220_vm0, %v378_v36  ;;  %s423_s4 = scalar_lea.hbm %s1229_s30, %s567_s3  ;;  %s425_s29 = sshll.u32 %s207_s0, 4  ;;  %s426_s29 = int_to_ptr.vmem [resolvable:$true] %s425_s29 }
  0x69   : > { %s427_s14 = sshll.u32 %s423_s4, 4  ;;  %s707_s20 = scalar_lea.hbm %s1229_s30, 16  ;;  %s428_s14 = int_to_ptr.hbm [resolvable:$true] %s427_s14 }
  0x6a   : > { %s701_s10 = sshra.s32 %s428_s14, 4  ;;  %s702_s10 = int_to_ptr.hbm [resolvable:$true] %s701_s10 }
  0x6b   : > { %s703_s9 = scalar_lea.hbm %s702_s10, 8  ;;  %p708_p8 = scmp.lt.s32.totalorder %s702_s10, %s1229_s30 }
  0x6c   : > { %p704_p5 = scmp.ne.s32.totalorder %s702_s10, %s703_s9  ;;  %p709_p10 = scmp.lt.s32.totalorder %s707_s20, %s703_s9 }
  0x6e   : > { %p705_p6 = pnand %p704_p5, %p854_p9  ;;  %p710_p13 = por %p709_p10, %p708_p8 }
  0x6f   : > { %v402_v44 = vld [vmem:[#allocation2 + $0x18] sm:$0xff] }
  0x70   : > { %p706_p7 = pneg %p705_p6 }
  0x72   : > { %p711_p0 = pnand %p710_p13, %p706_p7 }
  0xaa   : > { %v385_v37 = vpop.permute.xlu0 %384  ;;  %v398_v38 = vpop.permute.xlu1 %397 }
  0xab   : > { %v387_v45 = vmul.f32 %v385_v37, %v381_v39  ;;  %v400_v47 = vmul.f32 %v398_v38, %v395_v41 }
  0xb3   : > { %v391_v42 = vpop.permute.xlu0 %390  ;;  %v405_v43 = vpop.permute.xlu1 %404 }
  0xb4   : > { %v393_v46 = vmul.f32 %v391_v42, %v388_v40  ;;  %v407_v49 = vmul.f32 %v405_v43, %v402_v44 }
  0xb6   : > { %v394_v48 = vadd.f32 %v393_v46, %v387_v45 }
  0xb8   : > { %v401_v50 = vadd.f32 %v400_v47, %v394_v48 }
  0xba   : > { %v408_v51 = vadd.f32 %v407_v49, %v401_v50 }
  0xbc   : > { %410 = vst.msk [vmem:[%s207_s0] sm:$0xff] %vm409_vm1, %v408_v51 }
  0xbd   : > { %714 = shalt.err (!%p711_p0)
}
  0xbe   : > { %573 = dma.vmem_to_hbm [thread:$0]  (%p854_p9), %s426_s29, 128, %s428_s14, %s412_s7  }
  0xbf PF: > { %s1231_s21 = sld [smem:[#allocation12_spill]]  ;;  %p580_p1 = pnand %p557_p12, %p861_p11 }
  0xc0   : > { %s1233_s27 = sld [smem:[#allocation17_spill]] }
  0xc1   : > { %p581_p2 = pneg %p580_p1 }
  0xc5   : > { %s439_s11 = sand.u32 1, %s1231_s21  }
  0xc6   : > { %s440_s12 = scalar_lea.sflag [#allocation7], %s439_s11 }
  0xc7   : > { %746 = dma.done.wait (%p581_p2), %s440_s12, 128  }
  0xc8   : > { %748 = vsyncadd (%p581_p2), %s440_s12, 4294967168  ;;  %s27_s0 = sadd.s32 1, %s1233_s27   ;;  %s1234_s16 = sld [smem:[#allocation13_spill]] }
  0xc9   : > { %p24_p3 = scmp.ge.s32.totalorder %s27_s0, 4   ;;  %s1235_s17 = sld [smem:[#allocation14_spill]] }
  0xca   : > { %s1236_s18 = sld [smem:[#allocation20_spill]] }
  0xcb   : > { %s1237_s19 = sld [smem:[#allocation16_spill]]  ;;  %26 = sbr.rel (!%p24_p3) target bundleno = 14 (0xe), region = 111 }
  0xcc   : > { %s1238_s20 = sld [smem:[#allocation18_spill]] }
  0xd0   :  { %446 = vsyncpa [#allocation6], 1 }
  0xd1   :  { %448 = vsyncpa [#allocation6 + $0x1], 1 }
  0xd2   :  { %449 = vsyncpa [#allocation7], 1 }
  0xd3   :  { %451 = vsyncpa [#allocation7 + $0x1], 1 }

</bundles_post_ra>
